<compile_context>
chip_gen: v7x
topology: tpu7x:2x2x1
jax: 0.10.0
libtpu: 0.0.40
codegen_flags: <defaults>
</compile_context>

<pallas_src>
import functools

import jax
import jax.numpy as jnp
from jax.experimental import pallas as pl
from jax.experimental.pallas import tpu as pltpu

EPS = 1e-6  # LayerNorm eps from the PyTorch module


def _sublayer_connection_kernel(x_ref, a2_ref, b2_ref, w_ref, bias_ref,
                                *rest, dropout_p):
    if dropout_p > 0.0:
        bits_ref, o_ref = rest
    else:
        (o_ref,) = rest

    # --- LayerNorm (torch semantics: unbiased std, eps on std) ------------
    x = x_ref[...].astype(jnp.float32)                       # (TM, D)
    d = x.shape[-1]                                           # D must be > 1
    mean = jnp.mean(x, axis=-1, keepdims=True)
    diff = x - mean
    var_unbiased = jnp.sum(diff * diff, axis=-1, keepdims=True) * (1.0 / (d - 1))
    # Divide once on the narrow (TM, 1) column; the per-element (TM, D) path
    # below is multiply-only (keeps the VPU slot light).
    inv_std = 1.0 / (jnp.sqrt(var_unbiased) + EPS)            # (TM, 1)
    y = (diff * inv_std) * a2_ref[...] + b2_ref[...]          # (TM, D), f32

    # --- example sublayer: Linear(D, D) on the MXU (bf16 in, f32 acc) -----
    z = jnp.dot(y.astype(jnp.bfloat16), w_ref[...],
                preferred_element_type=jnp.float32) + bias_ref[...]

    # --- dropout (training mode, inverted; integer-threshold compare) -----
    if dropout_p > 0.0:
        # P(keep) = P(bits >= thresh) = 1 - dropout_p
        thresh = jnp.uint32(min(int(dropout_p * 4294967296.0), 4294967295))
        keep = bits_ref[...] >= thresh
        z = jnp.where(keep, z * (1.0 / (1.0 - dropout_p)), 0.0)
    # dropout_p == 0.0 -> identity (eval-mode nn.Dropout)

    # --- residual ----------------------------------------------------------
    o_ref[...] = (x + z).astype(o_ref.dtype)


def _pick_block_rows(rows, target):
    """Largest divisor of `rows` <= target, preferring multiples of 8."""
    target = max(1, min(int(target), rows))
    for cand in range(target, 0, -1):
        if rows % cand == 0 and (cand % 8 == 0 or cand == rows):
            return cand
    for cand in range(target, 0, -1):
        if rows % cand == 0:
            return cand
    return rows


def sublayer_connection(x, a2, b2, w, bias, *, dropout_p=0.0,
                        dropout_key=None, block_rows=None):
    """x: (B, S, D). a2/b2: (D,) LayerNorm params. w: (D, D), bias: (D,).

    For performance D (the lane axis) should be a multiple of 128; the block
    always spans the full D so any D is still correct.
    On v5e prefer a smaller `block_rows` (e.g. 256) due to the 16 MiB default
    scoped-VMEM limit.
    """
    B, S, D = x.shape
    rows = B * S
    x2 = x.reshape(rows, D)

    # Finite row tile so the 1-D grid actually software-pipelines; default
    # target 512 rows (measured ~85% of HBM roofline for tiled elementwise).
    block_rows = _pick_block_rows(rows, block_rows if block_rows else 512)
    grid = (rows // block_rows,)

    a2r = a2.reshape(1, D).astype(jnp.float32)
    b2r = b2.reshape(1, D).astype(jnp.float32)
    biasr = bias.reshape(1, D).astype(jnp.float32)
    w_bf16 = w.astype(jnp.bfloat16)   # bf16 weights: MXU-native, halves HBM/VMEM
    # TODO(synk): for very large D (f32/bf16 W not fitting v7x's 64 MiB VMEM),
    # add a second grid axis tiling W over output features with a VMEM acc.

    row_spec = pl.BlockSpec((block_rows, D), lambda i: (i, 0))

    def const_spec(shape):
        # Grid-invariant operands: single-buffer them (no need for the default
        # double buffer; biggest VMEM saving for W).
        return pl.BlockSpec(shape, lambda i: (0, 0), pipeline_mode=pl.Buffered(1))

    in_specs = [
        row_spec,                 # x
        const_spec((1, D)),       # a_2
        const_spec((1, D)),       # b_2
        const_spec((D, D)),       # W (bf16)
        const_spec((1, D)),       # bias
    ]
    inputs = [x2, a2r, b2r, w_bf16, biasr]

    if dropout_p > 0.0:
        # TODO(synk): on real TPU this could use pltpu.prng_seed /
        # prng_random_bits in-kernel (no extra HBM stream), but those
        # primitives do not lower in interpret mode, so the random bits are
        # generated host-side with jax.random and streamed in.
        if dropout_key is None:
            dropout_key = jax.random.PRNGKey(0)
        bits = jax.random.bits(dropout_key, (rows, D), dtype=jnp.uint32)
        in_specs.append(pl.BlockSpec((block_rows, D), lambda i: (i, 0)))
        inputs.append(bits)

    # VMEM budget for the chosen tiling (with headroom), so larger tiles are
    # not rejected by the default scoped limit.
    itemsize = x2.dtype.itemsize
    blk_elems = block_rows * D
    vmem_need = (2 * blk_elems * itemsize                      # x (double-buffered)
                 + 2 * blk_elems * itemsize                    # out (double-buffered)
                 + (2 * blk_elems * 4 if dropout_p > 0.0 else 0)   # dropout bits
                 + D * D * 2 + 3 * D * 4)                      # single-buffered consts
    vmem_limit = int(min(max(2 * vmem_need + (4 << 20), 16 << 20), 64 << 20))

    out = pl.pallas_call(
        functools.partial(_sublayer_connection_kernel, dropout_p=float(dropout_p)),
        out_shape=jax.ShapeDtypeStruct((rows, D), x.dtype),
        grid=grid,
        in_specs=in_specs,
        out_specs=row_spec,
        compiler_params=pltpu.CompilerParams(
            dimension_semantics=("parallel",),   # rows independent -> both TCs on v7x
            vmem_limit_bytes=vmem_limit),
    )(*inputs)
    return out.reshape(B, S, D)


def _reference(x, a2, b2, w, bias):
    """Pure-JAX reference (eval-mode dropout == identity).

    Matmul uses the same bf16-operand / f32-accumulate path as the kernel.
    """
    xf = x.astype(jnp.float32)
    mean = jnp.mean(xf, axis=-1, keepdims=True)
    diff = xf - mean
    var = jnp.sum(diff * diff, axis=-1, keepdims=True) / (xf.shape[-1] - 1)
    std = jnp.sqrt(var)
    y = a2 * diff / (std + EPS) + b2
    z = jnp.dot(y.astype(jnp.bfloat16), w.astype(jnp.bfloat16),
                preferred_element_type=jnp.float32) + bias
    return (xf + z).astype(x.dtype)


if __name__ == "__main__":
    B, S, D = 2, 8, 128  # batch, sequence, model size (lane-dense: D % 128 == 0)

    key = jax.random.PRNGKey(0)
    kx, kw, kb, kd = jax.random.split(key, 4)
    x = jax.random.normal(kx, (B, S, D), dtype=jnp.float32)

    # LayerNorm params as initialized in the module: ones / zeros.
    a2 = jnp.ones((D,), dtype=jnp.float32)
    b2 = jnp.zeros((D,), dtype=jnp.float32)

    # Deterministic example sublayer: Linear(D, D).
    w = jax.random.normal(kw, (D, D), dtype=jnp.float32) * (1.0 / jnp.sqrt(D))
    bias = jax.random.normal(kb, (D,), dtype=jnp.float32) * 0.01

    # Eval-mode (dropout identity) -> must match reference.
    out = sublayer_connection(x, a2, b2, w, bias, dropout_p=0.0)
    out = jax.block_until_ready(out)
    ref = _reference(x, a2, b2, w, bias)
    assert out.shape == (B, S, D)
    assert jnp.allclose(out, ref, atol=1e-3, rtol=1e-3), "mismatch vs reference"

    # Training-mode dropout path (host-provided random bits) -- exercise it.
    out_drop = sublayer_connection(x, a2, b2, w, bias, dropout_p=0.5, dropout_key=kd)
    out_drop = jax.block_until_ready(out_drop)
    assert out_drop.shape == (B, S, D)
    assert bool(jnp.all(jnp.isfinite(out_drop)))

    print("KERNEL_OK")
</pallas_src>

<mosaic_0001>
module attributes {stable_mosaic.version = 11 : i64} {
  func.func @_sublayer_connection_kernel(%arg0: i32, %arg1: memref<16x128xf32, #tpu.memory_space<vmem>>, %arg2: memref<1x128xf32, #tpu.memory_space<vmem>>, %arg3: memref<1x128xf32, #tpu.memory_space<vmem>>, %arg4: memref<128x128xbf16, #tpu.memory_space<vmem>>, %arg5: memref<1x128xf32, #tpu.memory_space<vmem>>, %arg6: memref<16x128xf32, #tpu.memory_space<vmem>>) attributes {dimension_semantics = [#tpu.dimension_semantics<parallel>], iteration_bounds = array<i64: 1>, scalar_prefetch = 0 : i64, scratch_operands = 0 : i64, tpu.core_type = #tpu.core_type<tc>, window_params = [{transform_indices = @transform_0, window_bounds = array<i64: 16, 128>}, {pipeline_mode = #tpu.pipeline_mode<synchronous>, transform_indices = @transform_1, window_bounds = array<i64: 1, 128>}, {pipeline_mode = #tpu.pipeline_mode<synchronous>, transform_indices = @transform_2, window_bounds = array<i64: 1, 128>}, {pipeline_mode = #tpu.pipeline_mode<synchronous>, transform_indices = @transform_3, window_bounds = array<i64: 128, 128>}, {pipeline_mode = #tpu.pipeline_mode<synchronous>, transform_indices = @transform_4, window_bounds = array<i64: 1, 128>}, {transform_indices = @transform_5, window_bounds = array<i64: 16, 128>}]} {
    %c0 = arith.constant 0 : index
    %c0_0 = arith.constant 0 : index
    %0 = vector.load %arg1[%c0, %c0_0] : memref<16x128xf32, #tpu.memory_space<vmem>>, vector<16x128xf32>
    %cst = arith.constant dense<0.000000e+00> : vector<16xf32>
    %1 = vector.multi_reduction <add>, %0, %cst [1] : vector<16x128xf32> to vector<16xf32>
    %2 = vector.shape_cast %1 : vector<16xf32> to vector<16x1xf32>
    %cst_1 = arith.constant 1.280000e+02 : f32
    %3 = vector.broadcast %cst_1 : f32 to vector<16x1xf32>
    %4 = arith.divf %2, %3 : vector<16x1xf32>
    %5 = vector.broadcast %4 : vector<16x1xf32> to vector<16x128xf32>
    %6 = arith.subf %0, %5 : vector<16x128xf32>
    %7 = arith.mulf %6, %6 : vector<16x128xf32>
    %cst_2 = arith.constant dense<0.000000e+00> : vector<16xf32>
    %8 = vector.multi_reduction <add>, %7, %cst_2 [1] : vector<16x128xf32> to vector<16xf32>
    %9 = vector.shape_cast %8 : vector<16xf32> to vector<16x1xf32>
    %cst_3 = arith.constant 0.00787401571 : f32
    %10 = vector.broadcast %cst_3 : f32 to vector<16x1xf32>
    %11 = arith.mulf %9, %10 : vector<16x1xf32>
    %12 = math.sqrt %11 : vector<16x1xf32>
    %cst_4 = arith.constant 9.99999997E-7 : f32
    %13 = vector.broadcast %cst_4 : f32 to vector<16x1xf32>
    %14 = arith.addf %12, %13 : vector<16x1xf32>
    %cst_5 = arith.constant 1.000000e+00 : f32
    %15 = vector.broadcast %cst_5 : f32 to vector<16x1xf32>
    %16 = arith.divf %15, %14 : vector<16x1xf32>
    %17 = vector.broadcast %16 : vector<16x1xf32> to vector<16x128xf32>
    %18 = arith.mulf %6, %17 : vector<16x128xf32>
    %c0_6 = arith.constant 0 : index
    %c0_7 = arith.constant 0 : index
    %19 = vector.load %arg2[%c0_6, %c0_7] : memref<1x128xf32, #tpu.memory_space<vmem>>, vector<1x128xf32>
    %20 = vector.broadcast %19 : vector<1x128xf32> to vector<16x128xf32>
    %21 = arith.mulf %18, %20 : vector<16x128xf32>
    %c0_8 = arith.constant 0 : index
    %c0_9 = arith.constant 0 : index
    %22 = vector.load %arg3[%c0_8, %c0_9] : memref<1x128xf32, #tpu.memory_space<vmem>>, vector<1x128xf32>
    %23 = vector.broadcast %22 : vector<1x128xf32> to vector<16x128xf32>
    %24 = arith.addf %21, %23 : vector<16x128xf32>
    %25 = arith.truncf %24 : vector<16x128xf32> to vector<16x128xbf16>
    %c0_10 = arith.constant 0 : index
    %c0_11 = arith.constant 0 : index
    %26 = vector.load %arg4[%c0_10, %c0_11] : memref<128x128xbf16, #tpu.memory_space<vmem>>, vector<128x128xbf16>
    %cst_12 = arith.constant dense<0.000000e+00> : vector<16x128xf32>
    %27 = tpu.matmul %25, %26, %cst_12 {dimension_numbers = #tpu.dot_dimension_numbers<[1], [0], [0], [1], [0, 0, 1, 1], [], []>} : vector<16x128xbf16>, vector<128x128xbf16>, vector<16x128xf32> -> vector<16x128xf32>
    %c0_13 = arith.constant 0 : index
    %c0_14 = arith.constant 0 : index
    %28 = vector.load %arg5[%c0_13, %c0_14] : memref<1x128xf32, #tpu.memory_space<vmem>>, vector<1x128xf32>
    %29 = vector.broadcast %28 : vector<1x128xf32> to vector<16x128xf32>
    %30 = arith.addf %27, %29 : vector<16x128xf32>
    %31 = arith.addf %0, %30 : vector<16x128xf32>
    %c0_15 = arith.constant 0 : index
    %c0_16 = arith.constant 0 : index
    %32 = vector.load %arg6[%c0_15, %c0_16] : memref<16x128xf32, #tpu.memory_space<vmem>>, vector<16x128xf32>
    tpu.vector_store %arg6[%c0_15, %c0_16], %31 {strides = array<i32>} : memref<16x128xf32, #tpu.memory_space<vmem>>, vector<16x128xf32>,
    return
  }
  func.func @transform_0(%arg0: i32) -> (i32, i32) {
    %c0_i32 = arith.constant 0 : i32
    %c0_i32_0 = arith.constant 0 : i32
    return %arg0, %c0_i32 : i32, i32
  }
  func.func @transform_1(%arg0: i32) -> (i32, i32) {
    %c0_i32 = arith.constant 0 : i32
    %c0_i32_0 = arith.constant 0 : i32
    %c0_i32_1 = arith.constant 0 : i32
    return %c0_i32, %c0_i32_0 : i32, i32
  }
  func.func @transform_2(%arg0: i32) -> (i32, i32) {
    %c0_i32 = arith.constant 0 : i32
    %c0_i32_0 = arith.constant 0 : i32
    %c0_i32_1 = arith.constant 0 : i32
    return %c0_i32, %c0_i32_0 : i32, i32
  }
  func.func @transform_3(%arg0: i32) -> (i32, i32) {
    %c0_i32 = arith.constant 0 : i32
    %c0_i32_0 = arith.constant 0 : i32
    %c0_i32_1 = arith.constant 0 : i32
    return %c0_i32, %c0_i32_0 : i32, i32
  }
  func.func @transform_4(%arg0: i32) -> (i32, i32) {
    %c0_i32 = arith.constant 0 : i32
    %c0_i32_0 = arith.constant 0 : i32
    %c0_i32_1 = arith.constant 0 : i32
    return %c0_i32, %c0_i32_0 : i32, i32
  }
  func.func @transform_5(%arg0: i32) -> (i32, i32) {
    %c0_i32 = arith.constant 0 : i32
    %c0_i32_0 = arith.constant 0 : i32
    return %arg0, %c0_i32 : i32, i32
  }
}

</mosaic_0001>

<bundles_post_ra>
// kernel: tpu_custom_call.1
= control target key start
LH: loop header
LB: loop body
LE: loop exit
PB: predicated region body
PF: predicated region fallthrough
CT: control target
= control target key end

     0   :  { %10 = vsyncpa [#allocation3], 0  ;;  %s481_s0 = inlined_call_operand.hbm [shape: f32[16,128], index: 0, kind: input, shape index: {}]   ;;  %s482_s1 = inlined_call_operand.vmem [shape: f32[1,128], index: 1, kind: input, shape index: {}]   ;;  %s483_s2 = inlined_call_operand.vmem [shape: f32[1,128], index: 2, kind: input, shape index: {}]   ;;  %s484_s3 = inlined_call_operand.hbm [shape: bf16[128,128], index: 3, kind: input, shape index: {}]   ;;  %s485_s4 = inlined_call_operand.vmem [shape: f32[1,128], index: 4, kind: input, shape index: {}]   ;;  %s486_s5 = inlined_call_operand.hbm [shape: f32[16,128], index: 5, kind: output, shape index: {}]  }
   0x1   :  { %11 = vsyncpa [#allocation6], 0 }
   0x2   :  { %12 = vsyncpa [#allocation4], 0  ;;  %s381_s18 = smov [#allocation2]   ;;  %s309_s22 = scalar_lea.hbm %s481_s0, 256 }
   0x3   :  { %s18_s19 = sshll.u32 %s381_s18, 4  ;;  %p310_p0 = scmp.ne.s32.totalorder %s481_s0, %s309_s22  ;;  %s19_s19 = int_to_ptr.vmem [resolvable:$true] %s18_s19 }
   0x4   :  { %p313_p1 = scmp.lt.u32.totalorder %s309_s22, %s481_s0 }
   0x6   :  { %p315_p2 = pnand %p313_p1, %p310_p0 }
   0x8   :  { %318 = shalt.err (!%p315_p2)
}
   0x9   :  { %s319_s27 = scalar_lea.vmem %s19_s19, 256  ;;  %p324_p4 = scmp.lt.s32.totalorder %s19_s19, %s19_s19 }
   0xa   :  { %p320_p3 = scmp.ne.s32.totalorder %s19_s19, %s319_s27  ;;  %p325_p5 = scmp.lt.s32.totalorder %s319_s27, %s319_s27 }
   0xc   :  { %p326_p6 = por %p325_p5, %p324_p4 }
   0xe   :  { %p327_p7 = pnand %p326_p6, %p320_p3 }
  0x10   :  { %330 = shalt.err (!%p327_p7)
}
  0x11   :  { %s382_s28 = smov 128   ;;  %s383_s29 = smov 8  }
  0x12   :  { %24 = dma.hbm_to_vmem [thread:$0]  %s481_s0, 256, %s19_s19, [#allocation3], %s382_s28, %s382_s28, %s383_s29  }
  0x13   :  { %s384_s7 = smov [#allocation5]   ;;  %s331_s11 = scalar_lea.hbm %s484_s3, 1024 }
  0x14   :  { %s34_s8 = sshll.u32 %s384_s7, 4  ;;  %p332_p8 = scmp.ne.s32.totalorder %s484_s3, %s331_s11  ;;  %s35_s8 = int_to_ptr.vmem [resolvable:$true] %s34_s8 }
  0x15   :  { %p335_p9 = scmp.lt.u32.totalorder %s331_s11, %s484_s3 }
  0x17   :  { %p337_p10 = pnand %p335_p9, %p332_p8 }
  0x19   :  { %340 = shalt.err (!%p337_p10)
}
  0x1a   :  { %s341_s16 = scalar_lea.vmem %s35_s8, 1024  ;;  %p346_p12 = scmp.lt.s32.totalorder %s35_s8, %s35_s8 }
  0x1b   :  { %p342_p11 = scmp.ne.s32.totalorder %s35_s8, %s341_s16  ;;  %p347_p13 = scmp.lt.s32.totalorder %s341_s16, %s341_s16 }
  0x1d   :  { %p348_p0 = por %p347_p13, %p346_p12 }
  0x1f   :  { %p349_p1 = pnand %p348_p0, %p342_p11 }
  0x21   :  { %352 = shalt.err (!%p349_p1)
}
  0x22   :  { %s385_s0 = smov 64   ;;  %s386_s17 = smov 4  }
  0x23   :  { %40 = dma.hbm_to_vmem [thread:$0]  %s484_s3, 1024, %s35_s8, [#allocation6], %s385_s0, %s385_s0, %s386_s17  }
  0x24   :  { %375 = dma.done.wait [#allocation3], 256  }
  0x25   :  { %376 = vsyncadd [#allocation3], 4294967040 }
  0x26   :  { %377 = dma.done.wait [#allocation6], 1024  }
  0x27   :  { %378 = vsyncadd [#allocation6], 4294966272  ;;  %v447_v0 = vld [vmem:[#allocation2] sm:$0xff]  ;;  %v449_v1 = vld [vmem:[#allocation2 + $0x8] sm:$0xff]  ;;  %v387_v11 = vmov 0.0   ;;  %vm388_vm0 = vmmov 0  }
  0x28   :  { %52 = vadd.xlane.f32.xlu0 %v447_v0  ;;  %v293_v10 = vld [vmem:[#allocation5] sm:$0xff]   ;;  %264 = vmatprep.subr.bf16.mxu0 %v387_v11  ;;  %v294_v12 = vld [vmem:[#allocation5 + $0x8] sm:$0xff]   ;;  %v295_v13 = vld [vmem:[#allocation5 + $0x10] sm:$0xff]  }
  0x29   :  { %265 = vmatpush3.bf16.msra.mxu0 %v293_v10  ;;  %v296_v14 = vld [vmem:[#allocation5 + $0x18] sm:$0xff]   ;;  %v297_v15 = vld [vmem:[#allocation5 + $0x20] sm:$0xff]   ;;  %280 = vmatprep.mubr.msk.bf16.mxu0 %vm388_vm0, %v387_v11  ;;  %v298_v16 = vld [vmem:[#allocation5 + $0x28] sm:$0xff]  }
  0x2a   :  { %266 = vmatprep.subr.bf16.mxu0 %v387_v11  ;;  %v299_v17 = vld [vmem:[#allocation5 + $0x30] sm:$0xff]   ;;  %v300_v18 = vld [vmem:[#allocation5 + $0x38] sm:$0xff]  }
  0x2b   :  { %v244_v37 = vld [vmem:[%s482_s1] ss:$0 sm:$0xff]  ;;  %s389_s1 = smov [#allocation7]  }
  0x2c   :  { %54 = vadd.xlane.f32.xlu0 %v449_v1  ;;  %v245_v41 = vld [vmem:[%s483_s2] ss:$0 sm:$0xff]  ;;  %s231_s25 = sshll.u32 %s389_s1, 4  ;;  %s232_s25 = int_to_ptr.vmem [resolvable:$true] %s231_s25 }
  0x2d   :  { %267 = vmatpush3.bf16.msra.mxu0 %v294_v12  ;;  %v246_v46 = vld [vmem:[%s485_s4] ss:$0 sm:$0xff]  ;;  %s353_s2 = scalar_lea.vmem %s232_s25, 256  ;;  %p358_p3 = scmp.lt.s32.totalorder %s232_s25, %s232_s25 }
  0x2e   :  { %268 = vmatprep.subr.bf16.mxu0 %v387_v11  ;;  %p354_p2 = scmp.ne.s32.totalorder %s232_s25, %s353_s2  ;;  %p359_p4 = scmp.lt.s32.totalorder %s353_s2, %s353_s2 }
  0x30   :  { %p360_p5 = por %p359_p4, %p358_p3 }
  0x31   :  { %269 = vmatpush3.bf16.msra.mxu0 %v295_v13 }
  0x32   :  { %270 = vmatprep.subr.bf16.mxu0 %v387_v11  ;;  %p361_p6 = pnand %p360_p5, %p354_p2 }
  0x35   :  { %271 = vmatpush3.bf16.msra.mxu0 %v296_v14 }
  0x36   :  { %272 = vmatprep.subr.bf16.mxu0 %v387_v11 }
  0x39   :  { %273 = vmatpush3.bf16.msra.mxu0 %v297_v15 }
  0x3a   :  { %274 = vmatprep.subr.bf16.mxu0 %v387_v11 }
  0x3d   :  { %275 = vmatpush3.bf16.msra.mxu0 %v298_v16 }
  0x3e   :  { %276 = vmatprep.subr.bf16.mxu0 %v387_v11 }
  0x41   :  { %277 = vmatpush3.bf16.msra.mxu0 %v299_v17 }
  0x42   :  { %278 = vmatprep.subr.bf16.mxu0 %v387_v11 }
  0x45   :  { %279 = vmatpush3.bf16.msra.mxu0 %v300_v18 }
  0xb5   :  { %v53_v2 = vpop.xlane.xlu0 %52 }
  0xb6   :  { %v57_v3 = vmul.f32 0.0078125, %v53_v2 }
  0xb8   :  { %v59_v4 = vsub.f32 %v447_v0, %v57_v3 }
  0xb9   :  { %v55_v5 = vpop.xlane.xlu0 %54 }
  0xba   :  { %v58_v6 = vmul.f32 0.0078125, %v55_v5  ;;  %v61_v7 = vmul.f32 %v59_v4, %v59_v4 }
  0xbc   :  { %v60_v8 = vsub.f32 %v449_v1, %v58_v6  ;;  %63 = vadd.xlane.f32.xlu1 %v61_v7 }
  0xbe   :  { %v62_v9 = vmul.f32 %v60_v8, %v60_v8 }
  0xc0   :  { %65 = vadd.xlane.f32.xlu1 %v62_v9 }
 0x149   :  { %v64_v19 = vpop.xlane.xlu1 %63 }
 0x14a   :  { %v67_v20 = vmul.f32 0.007874016, %v64_v19 }
 0x14c   :  { %301 = vrsqrt.f32 %v67_v20  ;;  %vm71_vm1 = vcmp.eq.f32.partialorder %v67_v20, inf  ;;  %v74_v25 = vand.u32 2147483648, %v67_v20  ;;  %vm73_vm2 = vcmp.eq.f32.partialorder %v67_v20, 0.0 }
 0x14d   :  { %v66_v21 = vpop.xlane.xlu1 %65 }
 0x14e   :  { %v68_v22 = vmul.f32 0.007874016, %v66_v21 }
 0x150   :  { %303 = vrsqrt.f32 %v68_v22  ;;  %vm78_vm3 = vcmp.eq.f32.partialorder %v68_v22, inf  ;;  %v81_v31 = vand.u32 2147483648, %v68_v22  ;;  %vm80_vm4 = vcmp.eq.f32.partialorder %v68_v22, 0.0 }
 0x156   :  { %v302_v23 = vpop.eup %301 }
 0x157   :  { %v70_v24 = vmul.f32 %v302_v23, %v67_v20 }
 0x159   :  { %v72_v26 = vsel %vm71_vm1, %v67_v20, %v70_v24 }
 0x15a   :  { %v304_v27 = vpop.eup %303  ;;  %v75_v28 = vsel %vm73_vm2, %v74_v25, %v72_v26 }
 0x15b   :  { %v83_v29 = vadd.f32 1e-06, %v75_v28  ;;  %v77_v30 = vmul.f32 %v304_v27, %v68_v22 }
 0x15d   :  { %v79_v32 = vsel %vm78_vm3, %v68_v22, %v77_v30  ;;  %305 = vrcp.f32 %v83_v29 }
 0x15e   :  { %v82_v33 = vsel %vm80_vm4, %v81_v31, %v79_v32 }
 0x15f   :  { %v84_v34 = vadd.f32 1e-06, %v82_v33 }
 0x161   :  { %307 = vrcp.f32 %v84_v34 }
 0x167   :  { %v306_v35 = vpop.eup %305 }
 0x168   :  { %v89_v36 = vmul.f32 %v306_v35, %v59_v4 }
 0x16a   :  { %v98_v40 = vmul.f32 %v244_v37, %v89_v36 }
 0x16b   :  { %v308_v38 = vpop.eup %307 }
 0x16c   :  { %v90_v39 = vmul.f32 %v308_v38, %v60_v8  ;;  %v107_v43 = vadd.f32 %v245_v41, %v98_v40 }
 0x16e   :  { %v99_v42 = vmul.f32 %v244_v37, %v90_v39 }
 0x170   :  { %v108_v44 = vadd.f32 %v245_v41, %v99_v42 }
 0x172   :  { %v109_v45 = vpack.c.bf16 %v108_v44, %v107_v43 }
 0x174   :  { %281 = vmatmul.mubr.bf16.vlgmr.msra.gmra.mrb[0].mxu0 %v109_v45 }
 0x247   :  { %v215_v47 = vpop.f32.mrb[0].mxu0 }
 0x248   :  { %v216_v48 = vadd.f32 %v246_v46, %v215_v47  ;;  %v282_v49 = vpop.f32.mrb[1].mxu0 }
 0x249   :  { %v218_v50 = vpop.f32.mrb[2].mxu0 }
 0x24a   :  { %v222_v51 = vadd.f32 %v216_v48, %v447_v0  ;;  %v219_v52 = vadd.f32 %v246_v46, %v218_v50  ;;  %v283_v53 = vpop.f32.mrb[3].mxu0 }
 0x24c   :  { %224 = vst [vmem:[#allocation7] sm:$0xff] %v222_v51  ;;  %v223_v54 = vadd.f32 %v219_v52, %v449_v1 }
 0x24e   :  { %225 = vst [vmem:[#allocation7 + $0x8] sm:$0xff] %v223_v54 }
 0x24f   :  { %364 = shalt.err (!%p361_p6)
}
 0x250   :  { %s365_s27 = scalar_lea.hbm %s486_s5, 256 }
 0x251   :  { %p366_p7 = scmp.ne.s32.totalorder %s486_s5, %s365_s27  ;;  %p369_p8 = scmp.lt.u32.totalorder %s365_s27, %s486_s5 }
 0x253   :  { %p371_p9 = pnand %p369_p8, %p366_p7 }
 0x255   :  { %374 = shalt.err (!%p371_p9)
}
 0x256   :  { %237 = dma.vmem_to_hbm [thread:$0]  %s232_s25, 256, %s486_s5, [#allocation4], %s382_s28, %s382_s28, %s383_s29  }
 0x257   :  { %379 = dma.done.wait [#allocation4], 256  }
 0x258   :  { %380 = vsyncadd [#allocation4], 4294967040 }
 0x259   :  { %241 = vsyncpa [#allocation3], 1 }
 0x25a   :  { %242 = vsyncpa [#allocation6], 1 }
 0x25b   :  { %243 = vsyncpa [#allocation4], 1 }

</bundles_post_ra>
